<compile_context>
chip_gen: v6e
topology: v6e:2x2x1
jax: 0.10.0
libtpu: 0.0.40
codegen_flags: <defaults>
</compile_context>

<pallas_src>
import math
from functools import partial

import jax
import jax.numpy as jnp
from jax.experimental import pallas as pl
from jax.experimental.pallas import tpu as pltpu

NUM_LAYERS = 10   # 5 encoder + 5 decoder
_LANE = 128
_SUBLANE = 8


def _round_up(x, m):
    return ((x + m - 1) // m) * m


def _vmem_cap_bytes():
    """Chip-aware VMEM budget cap (leave headroom for compiler scratch)."""
    try:
        phys = int(pltpu.get_tpu_info().vmem_capacity_bytes)
    except Exception:
        phys = 64 << 20   # conservative fallback (v7x per-TC VMEM)
    return max(min(int(0.75 * phys), 100 << 20), 16 << 20)


def _ae_kernel(*refs):
    # refs: x, w0..w9, b0..b9, latent_out, decoded_out
    x_ref = refs[0]
    w_refs = refs[1:1 + NUM_LAYERS]
    b_refs = refs[1 + NUM_LAYERS:1 + 2 * NUM_LAYERS]
    latent_ref, decoded_ref = refs[1 + 2 * NUM_LAYERS:]

    h = x_ref[...]

    # ----- encoder: Linear -> ReLU (x4) -> Linear (no act after last) -----
    for i in range(5):
        h = jnp.dot(h, w_refs[i][...], preferred_element_type=jnp.float32)
        h = h + b_refs[i][...]
        if i < 4:
            # TODO(synk): the PyTorch module eval()'s an arbitrary `act`; nn.ReLU() assumed.
            h = jnp.maximum(h, 0.0)
    latent_ref[...] = h.astype(latent_ref.dtype)

    # ----- decoder: Linear -> ReLU (x4) -> Linear (no act after last) -----
    for i in range(5, 10):
        h = jnp.dot(h, w_refs[i][...], preferred_element_type=jnp.float32)
        h = h + b_refs[i][...]
        if i < 9:
            h = jnp.maximum(h, 0.0)
    decoded_ref[...] = h.astype(decoded_ref.dtype)


@partial(jax.jit, static_argnames=("batch_tile",))
def autoencoder_forward(x, weights, biases, *, batch_tile=2048):
    """x: [B, input_dim]; weights[i]: [in, out] (pre-transposed); biases[i]: [1, out]."""
    B, input_dim = x.shape
    latent_dim = weights[4].shape[1]
    dtype = x.dtype
    itemsize = jnp.dtype(dtype).itemsize

    # ---- batch tiling: bound remainder-tile waste while staying MXU-friendly ----
    B8 = _round_up(B, _SUBLANE)
    if B8 <= batch_tile:
        TB = B8                                       # single tile, no extra waste
    else:
        nt = pl.cdiv(B, batch_tile)                   # target number of tiles
        TB = _round_up(pl.cdiv(B, nt), _LANE)         # 128-multiple M for the MXU
    B_pad = _round_up(B, TB)
    if B_pad != B:
        x = jnp.pad(x, ((0, B_pad - B), (0, 0)))
    grid = (B_pad // TB,)

    # ---- specs (outputs at natural width: last block dim == full array dim) ----
    x_spec = pl.BlockSpec((TB, input_dim), lambda i: (i, 0))
    w_specs = [pl.BlockSpec(w.shape, lambda i: (0, 0)) for w in weights]   # VMEM-resident
    b_specs = [pl.BlockSpec(b.shape, lambda i: (0, 0)) for b in biases]
    out_specs = (pl.BlockSpec((TB, latent_dim), lambda i: (i, 0)),
                 pl.BlockSpec((TB, input_dim), lambda i: (i, 0)))
    out_shape = (jax.ShapeDtypeStruct((B_pad, latent_dim), dtype),
                 jax.ShapeDtypeStruct((B_pad, input_dim), dtype))

    # ---- scoped VMEM budget: double-buffered I/O tiles + params + activations ----
    param_bytes = sum(int(a.size) for a in list(weights) + list(biases)) * itemsize
    io_tile_bytes = TB * (input_dim + latent_dim + input_dim) * itemsize
    act_cols = sum(int(w.shape[1]) for w in weights)      # every layer's output width
    act_bytes = TB * act_cols * 4                         # f32 intermediates
    est = 2 * io_tile_bytes + 2 * param_bytes + act_bytes + (4 << 20)
    vmem_limit = int(min(max(est, 16 << 20), _vmem_cap_bytes()))

    latent, decoded = pl.pallas_call(
        _ae_kernel,
        grid=grid,
        in_specs=[x_spec] + w_specs + b_specs,
        out_specs=out_specs,
        out_shape=out_shape,
        compiler_params=pltpu.CompilerParams(
            dimension_semantics=("parallel",),
            vmem_limit_bytes=vmem_limit,
        ),
    )(x, *weights, *biases)

    # strip batch padding (no lane padding anymore)
    if B_pad != B:
        latent = latent[:B]
        decoded = decoded[:B]
    return latent, decoded


def init_params(key, input_dim, hidden_dim):
    """Deterministic init mimicking PyTorch nn.Linear default (U[-1/sqrt(in), 1/sqrt(in)]).

    Weights are returned as [in, out] (already transposed for x @ W)."""
    dims = [input_dim] + list(hidden_dim)
    layer_dims = []
    for i in range(5):                       # encoder
        layer_dims.append((dims[i], dims[i + 1]))
    for i in range(5, 0, -1):                # decoder (mirror)
        layer_dims.append((dims[i], dims[i - 1]))

    weights, biases = [], []
    for (fan_in, fan_out) in layer_dims:
        key, kw, kb = jax.random.split(key, 3)
        bound = 1.0 / math.sqrt(fan_in)
        w = jax.random.uniform(kw, (fan_in, fan_out), jnp.float32, -bound, bound)
        b = jax.random.uniform(kb, (1, fan_out), jnp.float32, -bound, bound)
        weights.append(w)
        biases.append(b)
    return weights, biases


def reference_forward(x, weights, biases):
    """Pure-JAX reference matching the PyTorch forward semantics."""
    h = x
    for i in range(5):
        h = h @ weights[i] + biases[i]
        if i < 4:
            h = jnp.maximum(h, 0.0)
    latent = h
    for i in range(5, 10):
        h = h @ weights[i] + biases[i]
        if i < 9:
            h = jnp.maximum(h, 0.0)
    return latent, h


if __name__ == "__main__":
    key = jax.random.PRNGKey(0)
    k_x, k_p, k_x2, k_x3 = jax.random.split(key, 4)

    batch = 8
    input_dim = 64
    hidden_dim = [32, 16, 16, 8, 4]

    weights, biases = init_params(k_p, input_dim, hidden_dim)

    # small shape (single tile, natural widths)
    x = jax.random.normal(k_x, (batch, input_dim), dtype=jnp.float32)
    latent, decoded = autoencoder_forward(x, weights, biases)
    jax.block_until_ready((latent, decoded))

    latent_ref, decoded_ref = reference_forward(x, weights, biases)
    assert latent.shape == (batch, hidden_dim[-1])
    assert decoded.shape == (batch, input_dim)
    assert jnp.allclose(latent, latent_ref, atol=1e-5, rtol=1e-5)
    assert jnp.allclose(decoded, decoded_ref, atol=1e-5, rtol=1e-5)

    # batch that is not a multiple of the tile (single 600-row tile, no waste)
    x2 = jax.random.normal(k_x2, (600, input_dim), dtype=jnp.float32)
    latent2, decoded2 = autoencoder_forward(x2, weights, biases)
    jax.block_until_ready((latent2, decoded2))
    latent2_ref, decoded2_ref = reference_forward(x2, weights, biases)
    assert latent2.shape == (600, hidden_dim[-1])
    assert decoded2.shape == (600, input_dim)
    assert jnp.allclose(latent2, latent2_ref, atol=1e-5, rtol=1e-5)
    assert jnp.allclose(decoded2, decoded2_ref, atol=1e-5, rtol=1e-5)

    # larger batch exercising the pipelined multi-tile grid + remainder padding
    x3 = jax.random.normal(k_x3, (4500, input_dim), dtype=jnp.float32)
    latent3, decoded3 = autoencoder_forward(x3, weights, biases)
    jax.block_until_ready((latent3, decoded3))
    latent3_ref, decoded3_ref = reference_forward(x3, weights, biases)
    assert latent3.shape == (4500, hidden_dim[-1])
    assert decoded3.shape == (4500, input_dim)
    assert jnp.allclose(latent3, latent3_ref, atol=1e-5, rtol=1e-5)
    assert jnp.allclose(decoded3, decoded3_ref, atol=1e-5, rtol=1e-5)

    print("KERNEL_OK")
</pallas_src>

<mosaic_0001>
module attributes {stable_mosaic.version = 11 : i64} {
  func.func @_ae_kernel(%arg0: i32, %arg1: memref<8x64xf32, #tpu.memory_space<vmem>>, %arg2: memref<64x32xf32, #tpu.memory_space<vmem>>, %arg3: memref<32x16xf32, #tpu.memory_space<vmem>>, %arg4: memref<16x16xf32, #tpu.memory_space<vmem>>, %arg5: memref<16x8xf32, #tpu.memory_space<vmem>>, %arg6: memref<8x4xf32, #tpu.memory_space<vmem>>, %arg7: memref<4x8xf32, #tpu.memory_space<vmem>>, %arg8: memref<8x16xf32, #tpu.memory_space<vmem>>, %arg9: memref<16x16xf32, #tpu.memory_space<vmem>>, %arg10: memref<16x32xf32, #tpu.memory_space<vmem>>, %arg11: memref<32x64xf32, #tpu.memory_space<vmem>>, %arg12: memref<1x32xf32, #tpu.memory_space<vmem>>, %arg13: memref<1x16xf32, #tpu.memory_space<vmem>>, %arg14: memref<1x16xf32, #tpu.memory_space<vmem>>, %arg15: memref<1x8xf32, #tpu.memory_space<vmem>>, %arg16: memref<1x4xf32, #tpu.memory_space<vmem>>, %arg17: memref<1x8xf32, #tpu.memory_space<vmem>>, %arg18: memref<1x16xf32, #tpu.memory_space<vmem>>, %arg19: memref<1x16xf32, #tpu.memory_space<vmem>>, %arg20: memref<1x32xf32, #tpu.memory_space<vmem>>, %arg21: memref<1x64xf32, #tpu.memory_space<vmem>>, %arg22: memref<8x4xf32, #tpu.memory_space<vmem>>, %arg23: memref<8x64xf32, #tpu.memory_space<vmem>>) attributes {dimension_semantics = [#tpu.dimension_semantics<parallel>], iteration_bounds = array<i64: 1>, scalar_prefetch = 0 : i64, scratch_operands = 0 : i64, tpu.core_type = #tpu.core_type<tc>, window_params = [{transform_indices = @transform_0, window_bounds = array<i64: 8, 64>}, {pipeline_mode = #tpu.pipeline_mode<synchronous>, transform_indices = @transform_1, window_bounds = array<i64: 64, 32>}, {pipeline_mode = #tpu.pipeline_mode<synchronous>, transform_indices = @transform_2, window_bounds = array<i64: 32, 16>}, {pipeline_mode = #tpu.pipeline_mode<synchronous>, transform_indices = @transform_3, window_bounds = array<i64: 16, 16>}, {pipeline_mode = #tpu.pipeline_mode<synchronous>, transform_indices = @transform_4, window_bounds = array<i64: 16, 8>}, {pipeline_mode = #tpu.pipeline_mode<synchronous>, transform_indices = @transform_5, window_bounds = array<i64: 8, 4>}, {pipeline_mode = #tpu.pipeline_mode<synchronous>, transform_indices = @transform_6, window_bounds = array<i64: 4, 8>}, {pipeline_mode = #tpu.pipeline_mode<synchronous>, transform_indices = @transform_7, window_bounds = array<i64: 8, 16>}, {pipeline_mode = #tpu.pipeline_mode<synchronous>, transform_indices = @transform_8, window_bounds = array<i64: 16, 16>}, {pipeline_mode = #tpu.pipeline_mode<synchronous>, transform_indices = @transform_9, window_bounds = array<i64: 16, 32>}, {pipeline_mode = #tpu.pipeline_mode<synchronous>, transform_indices = @transform_10, window_bounds = array<i64: 32, 64>}, {pipeline_mode = #tpu.pipeline_mode<synchronous>, transform_indices = @transform_11, window_bounds = array<i64: 1, 32>}, {pipeline_mode = #tpu.pipeline_mode<synchronous>, transform_indices = @transform_12, window_bounds = array<i64: 1, 16>}, {pipeline_mode = #tpu.pipeline_mode<synchronous>, transform_indices = @transform_13, window_bounds = array<i64: 1, 16>}, {pipeline_mode = #tpu.pipeline_mode<synchronous>, transform_indices = @transform_14, window_bounds = array<i64: 1, 8>}, {pipeline_mode = #tpu.pipeline_mode<synchronous>, transform_indices = @transform_15, window_bounds = array<i64: 1, 4>}, {pipeline_mode = #tpu.pipeline_mode<synchronous>, transform_indices = @transform_16, window_bounds = array<i64: 1, 8>}, {pipeline_mode = #tpu.pipeline_mode<synchronous>, transform_indices = @transform_17, window_bounds = array<i64: 1, 16>}, {pipeline_mode = #tpu.pipeline_mode<synchronous>, transform_indices = @transform_18, window_bounds = array<i64: 1, 16>}, {pipeline_mode = #tpu.pipeline_mode<synchronous>, transform_indices = @transform_19, window_bounds = array<i64: 1, 32>}, {pipeline_mode = #tpu.pipeline_mode<synchronous>, transform_indices = @transform_20, window_bounds = array<i64: 1, 64>}, {transform_indices = @transform_21, window_bounds = array<i64: 8, 4>}, {transform_indices = @transform_22, window_bounds = array<i64: 8, 64>}]} {
    %c0 = arith.constant 0 : index
    %c0_0 = arith.constant 0 : index
    %0 = vector.load %arg1[%c0, %c0_0] : memref<8x64xf32, #tpu.memory_space<vmem>>, vector<8x64xf32>
    %c0_1 = arith.constant 0 : index
    %c0_2 = arith.constant 0 : index
    %1 = vector.load %arg2[%c0_1, %c0_2] : memref<64x32xf32, #tpu.memory_space<vmem>>, vector<64x32xf32>
    %cst = arith.constant dense<0.000000e+00> : vector<8x32xf32>
    %2 = tpu.matmul %0, %1, %cst {dimension_numbers = #tpu.dot_dimension_numbers<[1], [0], [0], [1], [0, 0, 1, 1], [], []>} : vector<8x64xf32>, vector<64x32xf32>, vector<8x32xf32> -> vector<8x32xf32>
    %c0_3 = arith.constant 0 : index
    %c0_4 = arith.constant 0 : index
    %3 = vector.load %arg12[%c0_3, %c0_4] : memref<1x32xf32, #tpu.memory_space<vmem>>, vector<1x32xf32>
    %4 = vector.broadcast %3 : vector<1x32xf32> to vector<8x32xf32>
    %5 = arith.addf %2, %4 : vector<8x32xf32>
    %cst_5 = arith.constant 0.000000e+00 : f32
    %6 = vector.broadcast %cst_5 : f32 to vector<8x32xf32>
    %7 = arith.maximumf %5, %6 : vector<8x32xf32>
    %c0_6 = arith.constant 0 : index
    %c0_7 = arith.constant 0 : index
    %8 = vector.load %arg3[%c0_6, %c0_7] : memref<32x16xf32, #tpu.memory_space<vmem>>, vector<32x16xf32>
    %cst_8 = arith.constant dense<0.000000e+00> : vector<8x16xf32>
    %9 = tpu.matmul %7, %8, %cst_8 {dimension_numbers = #tpu.dot_dimension_numbers<[1], [0], [0], [1], [0, 0, 1, 1], [], []>} : vector<8x32xf32>, vector<32x16xf32>, vector<8x16xf32> -> vector<8x16xf32>
    %c0_9 = arith.constant 0 : index
    %c0_10 = arith.constant 0 : index
    %10 = vector.load %arg13[%c0_9, %c0_10] : memref<1x16xf32, #tpu.memory_space<vmem>>, vector<1x16xf32>
    %11 = vector.broadcast %10 : vector<1x16xf32> to vector<8x16xf32>
    %12 = arith.addf %9, %11 : vector<8x16xf32>
    %cst_11 = arith.constant 0.000000e+00 : f32
    %13 = vector.broadcast %cst_11 : f32 to vector<8x16xf32>
    %14 = arith.maximumf %12, %13 : vector<8x16xf32>
    %c0_12 = arith.constant 0 : index
    %c0_13 = arith.constant 0 : index
    %15 = vector.load %arg4[%c0_12, %c0_13] : memref<16x16xf32, #tpu.memory_space<vmem>>, vector<16x16xf32>
    %cst_14 = arith.constant dense<0.000000e+00> : vector<8x16xf32>
    %16 = tpu.matmul %14, %15, %cst_14 {dimension_numbers = #tpu.dot_dimension_numbers<[1], [0], [0], [1], [0, 0, 1, 1], [], []>} : vector<8x16xf32>, vector<16x16xf32>, vector<8x16xf32> -> vector<8x16xf32>
    %c0_15 = arith.constant 0 : index
    %c0_16 = arith.constant 0 : index
    %17 = vector.load %arg14[%c0_15, %c0_16] : memref<1x16xf32, #tpu.memory_space<vmem>>, vector<1x16xf32>
    %18 = vector.broadcast %17 : vector<1x16xf32> to vector<8x16xf32>
    %19 = arith.addf %16, %18 : vector<8x16xf32>
    %cst_17 = arith.constant 0.000000e+00 : f32
    %20 = vector.broadcast %cst_17 : f32 to vector<8x16xf32>
    %21 = arith.maximumf %19, %20 : vector<8x16xf32>
    %c0_18 = arith.constant 0 : index
    %c0_19 = arith.constant 0 : index
    %22 = vector.load %arg5[%c0_18, %c0_19] : memref<16x8xf32, #tpu.memory_space<vmem>>, vector<16x8xf32>
    %cst_20 = arith.constant dense<0.000000e+00> : vector<8x8xf32>
    %23 = tpu.matmul %21, %22, %cst_20 {dimension_numbers = #tpu.dot_dimension_numbers<[1], [0], [0], [1], [0, 0, 1, 1], [], []>} : vector<8x16xf32>, vector<16x8xf32>, vector<8x8xf32> -> vector<8x8xf32>
    %c0_21 = arith.constant 0 : index
    %c0_22 = arith.constant 0 : index
    %24 = vector.load %arg15[%c0_21, %c0_22] : memref<1x8xf32, #tpu.memory_space<vmem>>, vector<1x8xf32>
    %25 = vector.broadcast %24 : vector<1x8xf32> to vector<8x8xf32>
    %26 = arith.addf %23, %25 : vector<8x8xf32>
    %cst_23 = arith.constant 0.000000e+00 : f32
    %27 = vector.broadcast %cst_23 : f32 to vector<8x8xf32>
    %28 = arith.maximumf %26, %27 : vector<8x8xf32>
    %c0_24 = arith.constant 0 : index
    %c0_25 = arith.constant 0 : index
    %29 = vector.load %arg6[%c0_24, %c0_25] : memref<8x4xf32, #tpu.memory_space<vmem>>, vector<8x4xf32>
    %cst_26 = arith.constant dense<0.000000e+00> : vector<8x4xf32>
    %30 = tpu.matmul %28, %29, %cst_26 {dimension_numbers = #tpu.dot_dimension_numbers<[1], [0], [0], [1], [0, 0, 1, 1], [], []>} : vector<8x8xf32>, vector<8x4xf32>, vector<8x4xf32> -> vector<8x4xf32>
    %c0_27 = arith.constant 0 : index
    %c0_28 = arith.constant 0 : index
    %31 = vector.load %arg16[%c0_27, %c0_28] : memref<1x4xf32, #tpu.memory_space<vmem>>, vector<1x4xf32>
    %32 = vector.broadcast %31 : vector<1x4xf32> to vector<8x4xf32>
    %33 = arith.addf %30, %32 : vector<8x4xf32>
    %c0_29 = arith.constant 0 : index
    %c0_30 = arith.constant 0 : index
    %34 = vector.load %arg22[%c0_29, %c0_30] : memref<8x4xf32, #tpu.memory_space<vmem>>, vector<8x4xf32>
    tpu.vector_store %arg22[%c0_29, %c0_30], %33 {strides = array<i32>} : memref<8x4xf32, #tpu.memory_space<vmem>>, vector<8x4xf32>,
    %c0_31 = arith.constant 0 : index
    %c0_32 = arith.constant 0 : index
    %35 = vector.load %arg7[%c0_31, %c0_32] : memref<4x8xf32, #tpu.memory_space<vmem>>, vector<4x8xf32>
    %cst_33 = arith.constant dense<0.000000e+00> : vector<8x8xf32>
    %36 = tpu.matmul %33, %35, %cst_33 {dimension_numbers = #tpu.dot_dimension_numbers<[1], [0], [0], [1], [0, 0, 1, 1], [], []>} : vector<8x4xf32>, vector<4x8xf32>, vector<8x8xf32> -> vector<8x8xf32>
    %c0_34 = arith.constant 0 : index
    %c0_35 = arith.constant 0 : index
    %37 = vector.load %arg17[%c0_34, %c0_35] : memref<1x8xf32, #tpu.memory_space<vmem>>, vector<1x8xf32>
    %38 = vector.broadcast %37 : vector<1x8xf32> to vector<8x8xf32>
    %39 = arith.addf %36, %38 : vector<8x8xf32>
    %cst_36 = arith.constant 0.000000e+00 : f32
    %40 = vector.broadcast %cst_36 : f32 to vector<8x8xf32>
    %41 = arith.maximumf %39, %40 : vector<8x8xf32>
    %c0_37 = arith.constant 0 : index
    %c0_38 = arith.constant 0 : index
    %42 = vector.load %arg8[%c0_37, %c0_38] : memref<8x16xf32, #tpu.memory_space<vmem>>, vector<8x16xf32>
    %cst_39 = arith.constant dense<0.000000e+00> : vector<8x16xf32>
    %43 = tpu.matmul %41, %42, %cst_39 {dimension_numbers = #tpu.dot_dimension_numbers<[1], [0], [0], [1], [0, 0, 1, 1], [], []>} : vector<8x8xf32>, vector<8x16xf32>, vector<8x16xf32> -> vector<8x16xf32>
    %c0_40 = arith.constant 0 : index
    %c0_41 = arith.constant 0 : index
    %44 = vector.load %arg18[%c0_40, %c0_41] : memref<1x16xf32, #tpu.memory_space<vmem>>, vector<1x16xf32>
    %45 = vector.broadcast %44 : vector<1x16xf32> to vector<8x16xf32>
    %46 = arith.addf %43, %45 : vector<8x16xf32>
    %cst_42 = arith.constant 0.000000e+00 : f32
    %47 = vector.broadcast %cst_42 : f32 to vector<8x16xf32>
    %48 = arith.maximumf %46, %47 : vector<8x16xf32>
    %c0_43 = arith.constant 0 : index
    %c0_44 = arith.constant 0 : index
    %49 = vector.load %arg9[%c0_43, %c0_44] : memref<16x16xf32, #tpu.memory_space<vmem>>, vector<16x16xf32>
    %cst_45 = arith.constant dense<0.000000e+00> : vector<8x16xf32>
    %50 = tpu.matmul %48, %49, %cst_45 {dimension_numbers = #tpu.dot_dimension_numbers<[1], [0], [0], [1], [0, 0, 1, 1], [], []>} : vector<8x16xf32>, vector<16x16xf32>, vector<8x16xf32> -> vector<8x16xf32>
    %c0_46 = arith.constant 0 : index
    %c0_47 = arith.constant 0 : index
    %51 = vector.load %arg19[%c0_46, %c0_47] : memref<1x16xf32, #tpu.memory_space<vmem>>, vector<1x16xf32>
    %52 = vector.broadcast %51 : vector<1x16xf32> to vector<8x16xf32>
    %53 = arith.addf %50, %52 : vector<8x16xf32>
    %cst_48 = arith.constant 0.000000e+00 : f32
    %54 = vector.broadcast %cst_48 : f32 to vector<8x16xf32>
    %55 = arith.maximumf %53, %54 : vector<8x16xf32>
    %c0_49 = arith.constant 0 : index
    %c0_50 = arith.constant 0 : index
    %56 = vector.load %arg10[%c0_49, %c0_50] : memref<16x32xf32, #tpu.memory_space<vmem>>, vector<16x32xf32>
    %cst_51 = arith.constant dense<0.000000e+00> : vector<8x32xf32>
    %57 = tpu.matmul %55, %56, %cst_51 {dimension_numbers = #tpu.dot_dimension_numbers<[1], [0], [0], [1], [0, 0, 1, 1], [], []>} : vector<8x16xf32>, vector<16x32xf32>, vector<8x32xf32> -> vector<8x32xf32>
    %c0_52 = arith.constant 0 : index
    %c0_53 = arith.constant 0 : index
    %58 = vector.load %arg20[%c0_52, %c0_53] : memref<1x32xf32, #tpu.memory_space<vmem>>, vector<1x32xf32>
    %59 = vector.broadcast %58 : vector<1x32xf32> to vector<8x32xf32>
    %60 = arith.addf %57, %59 : vector<8x32xf32>
    %cst_54 = arith.constant 0.000000e+00 : f32
    %61 = vector.broadcast %cst_54 : f32 to vector<8x32xf32>
    %62 = arith.maximumf %60, %61 : vector<8x32xf32>
    %c0_55 = arith.constant 0 : index
    %c0_56 = arith.constant 0 : index
    %63 = vector.load %arg11[%c0_55, %c0_56] : memref<32x64xf32, #tpu.memory_space<vmem>>, vector<32x64xf32>
    %cst_57 = arith.constant dense<0.000000e+00> : vector<8x64xf32>
    %64 = tpu.matmul %62, %63, %cst_57 {dimension_numbers = #tpu.dot_dimension_numbers<[1], [0], [0], [1], [0, 0, 1, 1], [], []>} : vector<8x32xf32>, vector<32x64xf32>, vector<8x64xf32> -> vector<8x64xf32>
    %c0_58 = arith.constant 0 : index
    %c0_59 = arith.constant 0 : index
    %65 = vector.load %arg21[%c0_58, %c0_59] : memref<1x64xf32, #tpu.memory_space<vmem>>, vector<1x64xf32>
    %66 = vector.broadcast %65 : vector<1x64xf32> to vector<8x64xf32>
    %67 = arith.addf %64, %66 : vector<8x64xf32>
    %c0_60 = arith.constant 0 : index
    %c0_61 = arith.constant 0 : index
    %68 = vector.load %arg23[%c0_60, %c0_61] : memref<8x64xf32, #tpu.memory_space<vmem>>, vector<8x64xf32>
    tpu.vector_store %arg23[%c0_60, %c0_61], %67 {strides = array<i32>} : memref<8x64xf32, #tpu.memory_space<vmem>>, vector<8x64xf32>,
    return
  }
  func.func @transform_0(%arg0: i32) -> (i32, i32) {
    %c0_i32 = arith.constant 0 : i32
    %c0_i32_0 = arith.constant 0 : i32
    return %arg0, %c0_i32 : i32, i32
  }
  func.func @transform_1(%arg0: i32) -> (i32, i32) {
    %c0_i32 = arith.constant 0 : i32
    %c0_i32_0 = arith.constant 0 : i32
    %c0_i32_1 = arith.constant 0 : i32
    return %c0_i32, %c0_i32_0 : i32, i32
  }
  func.func @transform_2(%arg0: i32) -> (i32, i32) {
    %c0_i32 = arith.constant 0 : i32
    %c0_i32_0 = arith.constant 0 : i32
    %c0_i32_1 = arith.constant 0 : i32
    return %c0_i32, %c0_i32_0 : i32, i32
  }
  func.func @transform_3(%arg0: i32) -> (i32, i32) {
    %c0_i32 = arith.constant 0 : i32
    %c0_i32_0 = arith.constant 0 : i32
    %c0_i32_1 = arith.constant 0 : i32
    return %c0_i32, %c0_i32_0 : i32, i32
  }
  func.func @transform_4(%arg0: i32) -> (i32, i32) {
    %c0_i32 = arith.constant 0 : i32
    %c0_i32_0 = arith.constant 0 : i32
    %c0_i32_1 = arith.constant 0 : i32
    return %c0_i32, %c0_i32_0 : i32, i32
  }
  func.func @transform_5(%arg0: i32) -> (i32, i32) {
    %c0_i32 = arith.constant 0 : i32
    %c0_i32_0 = arith.constant 0 : i32
    %c0_i32_1 = arith.constant 0 : i32
    return %c0_i32, %c0_i32_0 : i32, i32
  }
  func.func @transform_6(%arg0: i32) -> (i32, i32) {
    %c0_i32 = arith.constant 0 : i32
    %c0_i32_0 = arith.constant 0 : i32
    %c0_i32_1 = arith.constant 0 : i32
    return %c0_i32, %c0_i32_0 : i32, i32
  }
  func.func @transform_7(%arg0: i32) -> (i32, i32) {
    %c0_i32 = arith.constant 0 : i32
    %c0_i32_0 = arith.constant 0 : i32
    %c0_i32_1 = arith.constant 0 : i32
    return %c0_i32, %c0_i32_0 : i32, i32
  }
  func.func @transform_8(%arg0: i32) -> (i32, i32) {
    %c0_i32 = arith.constant 0 : i32
    %c0_i32_0 = arith.constant 0 : i32
    %c0_i32_1 = arith.constant 0 : i32
    return %c0_i32, %c0_i32_0 : i32, i32
  }
  func.func @transform_9(%arg0: i32) -> (i32, i32) {
    %c0_i32 = arith.constant 0 : i32
    %c0_i32_0 = arith.constant 0 : i32
    %c0_i32_1 = arith.constant 0 : i32
    return %c0_i32, %c0_i32_0 : i32, i32
  }
  func.func @transform_10(%arg0: i32) -> (i32, i32) {
    %c0_i32 = arith.constant 0 : i32
    %c0_i32_0 = arith.constant 0 : i32
    %c0_i32_1 = arith.constant 0 : i32
    return %c0_i32, %c0_i32_0 : i32, i32
  }
  func.func @transform_11(%arg0: i32) -> (i32, i32) {
    %c0_i32 = arith.constant 0 : i32
    %c0_i32_0 = arith.constant 0 : i32
    %c0_i32_1 = arith.constant 0 : i32
    return %c0_i32, %c0_i32_0 : i32, i32
  }
  func.func @transform_12(%arg0: i32) -> (i32, i32) {
    %c0_i32 = arith.constant 0 : i32
    %c0_i32_0 = arith.constant 0 : i32
    %c0_i32_1 = arith.constant 0 : i32
    return %c0_i32, %c0_i32_0 : i32, i32
  }
  func.func @transform_13(%arg0: i32) -> (i32, i32) {
    %c0_i32 = arith.constant 0 : i32
    %c0_i32_0 = arith.constant 0 : i32
    %c0_i32_1 = arith.constant 0 : i32
    return %c0_i32, %c0_i32_0 : i32, i32
  }
  func.func @transform_14(%arg0: i32) -> (i32, i32) {
    %c0_i32 = arith.constant 0 : i32
    %c0_i32_0 = arith.constant 0 : i32
    %c0_i32_1 = arith.constant 0 : i32
    return %c0_i32, %c0_i32_0 : i32, i32
  }
  func.func @transform_15(%arg0: i32) -> (i32, i32) {
    %c0_i32 = arith.constant 0 : i32
    %c0_i32_0 = arith.constant 0 : i32
    %c0_i32_1 = arith.constant 0 : i32
    return %c0_i32, %c0_i32_0 : i32, i32
  }
  func.func @transform_16(%arg0: i32) -> (i32, i32) {
    %c0_i32 = arith.constant 0 : i32
    %c0_i32_0 = arith.constant 0 : i32
    %c0_i32_1 = arith.constant 0 : i32
    return %c0_i32, %c0_i32_0 : i32, i32
  }
  func.func @transform_17(%arg0: i32) -> (i32, i32) {
    %c0_i32 = arith.constant 0 : i32
    %c0_i32_0 = arith.constant 0 : i32
    %c0_i32_1 = arith.constant 0 : i32
    return %c0_i32, %c0_i32_0 : i32, i32
  }
  func.func @transform_18(%arg0: i32) -> (i32, i32) {
    %c0_i32 = arith.constant 0 : i32
    %c0_i32_0 = arith.constant 0 : i32
    %c0_i32_1 = arith.constant 0 : i32
    return %c0_i32, %c0_i32_0 : i32, i32
  }
  func.func @transform_19(%arg0: i32) -> (i32, i32) {
    %c0_i32 = arith.constant 0 : i32
    %c0_i32_0 = arith.constant 0 : i32
    %c0_i32_1 = arith.constant 0 : i32
    return %c0_i32, %c0_i32_0 : i32, i32
  }
  func.func @transform_20(%arg0: i32) -> (i32, i32) {
    %c0_i32 = arith.constant 0 : i32
    %c0_i32_0 = arith.constant 0 : i32
    %c0_i32_1 = arith.constant 0 : i32
    return %c0_i32, %c0_i32_0 : i32, i32
  }
  func.func @transform_21(%arg0: i32) -> (i32, i32) {
    %c0_i32 = arith.constant 0 : i32
    %c0_i32_0 = arith.constant 0 : i32
    return %arg0, %c0_i32 : i32, i32
  }
  func.func @transform_22(%arg0: i32) -> (i32, i32) {
    %c0_i32 = arith.constant 0 : i32
    %c0_i32_0 = arith.constant 0 : i32
    return %arg0, %c0_i32 : i32, i32
  }
}

</mosaic_0001>

<bundles_post_ra>
// kernel: autoencoder_forward.1
= control target key start
LH: loop header
LB: loop body
LE: loop exit
PB: predicated region body
PF: predicated region fallthrough
CT: control target
= control target key end

     0   :  { %s1398_s0 = inlined_call_operand.vmem [shape: f32[8,64], index: 0, kind: input, shape index: {}]   ;;  %s1399_s1 = inlined_call_operand.vmem [shape: f32[64,32], index: 1, kind: input, shape index: {}]   ;;  %s1400_s2 = inlined_call_operand.vmem [shape: f32[32,16], index: 2, kind: input, shape index: {}]   ;;  %s1401_s3 = inlined_call_operand.vmem [shape: f32[16,16], index: 3, kind: input, shape index: {}]   ;;  %s1402_s4 = inlined_call_operand.vmem [shape: f32[16,8], index: 4, kind: input, shape index: {}]   ;;  %s1403_s5 = inlined_call_operand.vmem [shape: f32[8,4], index: 5, kind: input, shape index: {}]   ;;  %s1404_s6 = inlined_call_operand.vmem [shape: f32[4,8], index: 6, kind: input, shape index: {}]   ;;  %s1405_s7 = inlined_call_operand.vmem [shape: f32[8,16], index: 7, kind: input, shape index: {}]   ;;  %s1406_s8 = inlined_call_operand.vmem [shape: f32[16,16], index: 8, kind: input, shape index: {}]   ;;  %s1407_s9 = inlined_call_operand.vmem [shape: f32[16,32], index: 9, kind: input, shape index: {}]   ;;  %s1408_s10 = inlined_call_operand.vmem [shape: f32[32,64], index: 10, kind: input, shape index: {}]   ;;  %s1409_s11 = inlined_call_operand.vmem [shape: f32[1,32], index: 11, kind: input, shape index: {}]   ;;  %s1410_s12 = inlined_call_operand.vmem [shape: f32[1,16], index: 12, kind: input, shape index: {}]   ;;  %s1411_s13 = inlined_call_operand.vmem [shape: f32[1,16], index: 13, kind: input, shape index: {}]   ;;  %s1412_s14 = inlined_call_operand.vmem [shape: f32[1,8], index: 14, kind: input, shape index: {}]   ;;  %s1413_s15 = inlined_call_operand.vmem [shape: f32[1,4], index: 15, kind: input, shape index: {}]   ;;  %s1414_s16 = inlined_call_operand.vmem [shape: f32[1,8], index: 16, kind: input, shape index: {}]   ;;  %s1415_s17 = inlined_call_operand.vmem [shape: f32[1,16], index: 17, kind: input, shape index: {}]   ;;  %s1416_s18 = inlined_call_operand.vmem [shape: f32[1,16], index: 18, kind: input, shape index: {}]   ;;  %s1417_s19 = inlined_call_operand.vmem [shape: f32[1,32], index: 19, kind: input, shape index: {}]   ;;  %s1418_s20 = inlined_call_operand.vmem [shape: f32[1,64], index: 20, kind: input, shape index: {}]   ;;  %s1419_s21 = inlined_call_operand.vmem [shape: f32[8,4], index: 21, kind: output, shape index: {0}]   ;;  %s1420_s22 = inlined_call_operand.hbm [shape: f32[8,64], index: 22, kind: output, shape index: {1}]  }
   0x1   :  { %1425 = sst [smem:[#allocation5_spill]] %s1398_s0 }
   0x2   :  { %1426 = sst [smem:[#allocation6_spill]] %s1399_s1 }
   0x3   :  { %1427 = sst [smem:[#allocation7_spill]] %s1400_s2 }
   0x4   :  { %1428 = sst [smem:[#allocation8_spill]] %s1401_s3 }
   0x5   :  { %1429 = sst [smem:[#allocation9_spill]] %s1402_s4 }
   0x6   :  { %1430 = sst [smem:[#allocation10_spill]] %s1403_s5 }
   0x7   :  { %1431 = sst [smem:[#allocation11_spill]] %s1404_s6 }
   0x8   :  { %s1432_s29 = sld [smem:[#allocation6_spill]]  ;;  %v1103_v1 = vmov 0.0   ;;  %vm1104_vm0 = vmmov 0  }
   0x9   :  { %994 = vmatprep.subr.mxu0 %v1103_v1  ;;  %1010 = vmatprep.mubr.msk.f32.mxu0 %vm1104_vm0, %v1103_v1  ;;  %s1433_s24 = sld [smem:[#allocation7_spill]] }
   0xa   :  { %1013 = vmatprep.subr.mxu1 %v1103_v1  ;;  %1021 = vmatprep.mubr.msk.f32.mxu1 %vm1104_vm0, %v1103_v1 }
   0xe   :  { %v79_v0 = vld [vmem:[%s1432_s29 + $0x38] sm:$0xff]  ;;  %v78_v2 = vld [vmem:[%s1432_s29 + $0x30] sm:$0xff]  ;;  %v77_v3 = vld [vmem:[%s1432_s29 + $0x28] sm:$0xff] }
   0xf   :  { %995 = vmatpush3.msra.mxu0 %v79_v0  ;;  %v165_v4 = vld [vmem:[%s1433_s24 + $0x18] sm:$0xff] }
  0x10   :  { %996 = vmatprep.subr.mxu0 %v1103_v1 }
  0x11   :  { %28 = vsyncpa [#allocation3], 0  ;;  %997 = vmatpush3.msra.mxu0 %v78_v2  ;;  %1014 = vmatpush3.msra.mxu1 %v165_v4  ;;  %v76_v5 = vld [vmem:[%s1432_s29 + $0x20] sm:$0xff]  ;;  %v75_v6 = vld [vmem:[%s1432_s29 + $0x18] sm:$0xff]  ;;  %s1434_s5 = sld [smem:[#allocation5_spill]]  ;;  %vm87_vm1 = vcmask 523264  }
  0x12   :  { %998 = vmatprep.subr.mxu0 %v1103_v1  ;;  %1015 = vmatprep.subr.mxu1 %v1103_v1  ;;  %v74_v7 = vld [vmem:[%s1432_s29 + $0x10] sm:$0xff]  ;;  %v73_v8 = vld [vmem:[%s1432_s29 + $0x8] sm:$0xff]  ;;  %v72_v9 = vld [vmem:[%s1432_s29] sm:$0xff]  ;;  %vm173_vm2 = vcmask 261120   ;;  %vm257_vm3 = vcmask 130048   ;;  %s1436_s25 = sld [smem:[#allocation9_spill]] }
  0x13   :  { %999 = vmatpush3.msra.mxu0 %v77_v3  ;;  %v164_v11 = vld [vmem:[%s1433_s24 + $0x10] sm:$0xff]  ;;  %v163_v12 = vld [vmem:[%s1433_s24 + $0x8] sm:$0xff]  ;;  %v162_v13 = vld [vmem:[%s1433_s24] sm:$0xff]  ;;  %s1435_s24 = sld [smem:[#allocation8_spill]]  ;;  %vm510_vm4 = vcmask 1043456   ;;  %vm423_vm5 = vcmask 64512  }
  0x14   :  { %1000 = vmatprep.subr.mxu0 %v1103_v1  ;;  %1016 = vmatpush3.msra.mxu1 %v164_v11  ;;  %v936_v14 = vld [vmem:[%s1409_s11] ss:$0 sm:$0xff]  ;;  %s1437_s28 = sld [smem:[#allocation10_spill]]  ;;  %vm497_vm6 = vcmask 31744   ;;  %v668_v50 = vld [vmem:[%s1406_s8 + $0x8] sm:$0xff]  ;;  %v836_v59 = vld [vmem:[%s1408_s10 + $0x18] sm:$0xff] }
  0x15   :  { %1001 = vmatpush3.msra.mxu0 %v76_v5  ;;  %1017 = vmatprep.subr.mxu1 %v1103_v1  ;;  %v938_v21 = vld [vmem:[%s1410_s12] ss:$0 sm:$0xff]  ;;  %v751_v57 = vld [vmem:[%s1407_s9 + $0x8] sm:$0xff]  ;;  %v835_v2 = vld [vmem:[%s1408_s10 + $0x10] sm:$0xff]  ;;  %s1105_s6 = smov [#allocation2]  }
  0x16   :  { %1002 = vmatprep.subr.mxu0 %v1103_v1  ;;  %1018 = vmatpush3.msra.mxu1 %v163_v12  ;;  %v940_v28 = vld [vmem:[%s1411_s13] ss:$0 sm:$0xff]  ;;  %v834_v3 = vld [vmem:[%s1408_s10 + $0x8] sm:$0xff] }
  0x17   :  { %1003 = vmatpush3.msra.mxu0 %v75_v6  ;;  %v71_v10 = vld [vmem:[%s1434_s5] sm:$0xff]  ;;  %1019 = vmatprep.subr.mxu1 %v1103_v1 }
  0x18   :  { %1004 = vmatprep.subr.mxu0 %v1103_v1  ;;  %1020 = vmatpush3.msra.mxu1 %v162_v13  ;;  %v333_v26 = vld [vmem:[%s1436_s25 + $0x8] sm:$0xff]  ;;  %v332_v27 = vld [vmem:[%s1436_s25] sm:$0xff] }
  0x19   :  { %1005 = vmatpush3.msra.mxu0 %v74_v7  ;;  %1024 = vmatprep.subr.mxu1 %v1103_v1  ;;  %v249_v19 = vld [vmem:[%s1435_s24 + $0x8] sm:$0xff]  ;;  %v248_v20 = vld [vmem:[%s1435_s24] sm:$0xff]  ;;  %s1438_s24 = sld [smem:[#allocation11_spill]] }
  0x1a   :  { %1006 = vmatprep.subr.mxu0 %v1103_v1  ;;  %v415_v33 = vld [vmem:[%s1437_s28] sm:$0xff] }
  0x1b   :  { %1007 = vmatpush3.msra.mxu0 %v73_v8  ;;  %v942_v35 = vld [vmem:[%s1412_s14] ss:$0 sm:$0xff] }
  0x1c   :  { %1008 = vmatprep.subr.mxu0 %v1103_v1  ;;  %v944_v40 = vld [vmem:[%s1413_s15] ss:$0 sm:$0xff]  ;;  %s926_s15 = sshll.u32 %s1105_s6, 4  ;;  %s927_s15 = int_to_ptr.vmem [resolvable:$true] %s926_s15 }
  0x1d   :  { %1009 = vmatpush3.msra.mxu0 %v72_v9  ;;  %v585_v44 = vld [vmem:[%s1405_s7] sm:$0xff]  ;;  %p1086_p1 = scmp.lt.s32.totalorder %s927_s15, %s927_s15 }
  0x1e   :  { %1011 = vmatmul.mubr.msk.f32.vlgmr.msra.gmra.mxu0 %vm87_vm1, %v71_v10  ;;  %1038 = vmatprep.subr.mxu0 %v1103_v1  ;;  %v946_v45 = vld [vmem:[%s1414_s16] ss:$0 sm:$0xff] }
  0x1f   :  { %1040 = vmatprep.mubr.msk.f32.mxu0 %vm1104_vm0, %v1103_v1  ;;  %1039 = vmatpush3.msra.mxu0 %v415_v33  ;;  %v499_v34 = vld [vmem:[%s1438_s24] sm:$0xf] }
  0x20   :  { %1048 = vmatprep.subr.mxu0 %v1103_v1  ;;  %v667_v51 = vld [vmem:[%s1406_s8] sm:$0xff] }
  0x21   :  { %v949_v52 = vld [vmem:[%s1415_s17] ss:$0 sm:$0xff] }
  0x22   :  { %v750_v58 = vld [vmem:[%s1407_s9] sm:$0xff] }
  0x23   :  { %v951_v60 = vld [vmem:[%s1416_s18] ss:$0 sm:$0xff] }
  0x24   :  { %v833_v4 = vld [vmem:[%s1408_s10] sm:$0xff]  ;;  %s1081_s10 = scalar_lea.vmem %s927_s15, 128 }
  0x25   :  { %v953_v5 = vld [vmem:[%s1417_s19] ss:$0 sm:$0xff]  ;;  %p1082_p0 = scmp.ne.s32.totalorder %s927_s15, %s1081_s10  ;;  %p1087_p2 = scmp.lt.s32.totalorder %s1081_s10, %s1081_s10 }
  0x26   :  { %v955_v10 = vld [vmem:[%s1418_s20] ss:$0 sm:$0xff] }
  0x27   :  { %p1088_p3 = por %p1087_p2, %p1086_p1 }
  0x29   :  { %p1089_p4 = pnand %p1088_p3, %p1082_p0 }
  0xde   :  { %v157_v15 = vpop.f32.mrf.mxu0 }
  0xdf   :  { %v158_v16 = vadd.f32 %v936_v14, %v157_v15 }
  0xe0   :  { %v1012_v17 = vpop.f32.mrf.mxu0 }
  0xe1   :  { %v161_v18 = vmax.f32 %v158_v16, 0.0 }
  0xe3   :  { %1022 = vmatmul.mubr.msk.f32.vlgmr.msra.gmra.mxu1 %vm173_vm2, %v161_v18 }
  0xe4   :  { %1028 = vmatprep.mubr.msk.f32.mxu1 %vm1104_vm0, %v1103_v1  ;;  %1025 = vmatpush3.msra.mxu1 %v249_v19 }
  0xe5   :  { %1026 = vmatprep.subr.mxu1 %v1103_v1 }
  0xe6   :  { %1027 = vmatpush3.msra.mxu1 %v248_v20 }
  0xe7   :  { %1031 = vmatprep.subr.mxu1 %v1103_v1 }
 0x1a3   :  { %v243_v22 = vpop.f32.mrf.mxu1 }
 0x1a4   :  { %v244_v23 = vadd.f32 %v938_v21, %v243_v22 }
 0x1a5   :  { %v1023_v24 = vpop.f32.mrf.mxu1 }
 0x1a6   :  { %v247_v25 = vmax.f32 %v244_v23, 0.0 }
 0x1a8   :  { %1029 = vmatmul.mubr.msk.f32.vlgmr.msra.gmra.mxu1 %vm257_vm3, %v247_v25 }
 0x1a9   :  { %1035 = vmatprep.mubr.msk.f32.mxu1 %vm1104_vm0, %v1103_v1  ;;  %1032 = vmatpush3.msra.mxu1 %v333_v26 }
 0x1aa   :  { %1033 = vmatprep.subr.mxu1 %v1103_v1 }
 0x1ab   :  { %1034 = vmatpush3.msra.mxu1 %v332_v27 }
 0x1ac   :  { %1043 = vmatprep.subr.mxu1 %v1103_v1 }
 0x268   :  { %v327_v29 = vpop.f32.mrf.mxu1 }
 0x269   :  { %v328_v30 = vadd.f32 %v940_v28, %v327_v29 }
 0x26a   :  { %v1030_v31 = vpop.f32.mrf.mxu1 }
 0x26b   :  { %v331_v32 = vmax.f32 %v328_v30, 0.0 }
 0x26d   :  { %1036 = vmatmul.mubr.msk.f32.vlgmr.msra.gmra.mxu1 %vm257_vm3, %v331_v32 }
 0x26e   :  { %1045 = vmatprep.mubr.msk.f32.mxu1 %vm1104_vm0, %v1103_v1  ;;  %1044 = vmatpush3.msk.msra.mxu1 %vm510_vm4, %v499_v34 }
 0x26f   :  { %1053 = vmatprep.subr.mxu1 %v1103_v1 }
 0x32d   :  { %v410_v36 = vpop.f32.mrf.mxu1 }
 0x32e   :  { %v411_v37 = vadd.f32 %v942_v35, %v410_v36 }
 0x32f   :  { %v1037_v38 = vpop.f32.mrf.mxu1 }
 0x330   :  { %v414_v39 = vmax.f32 %v411_v37, 0.0 }
 0x332   :  { %1041 = vmatmul.mubr.msk.f32.vlgmr.msra.gmra.mxu0 %vm423_vm5, %v414_v39 }
 0x333   :  { %1050 = vmatprep.mubr.msk.f32.mxu0 %vm1104_vm0, %v1103_v1  ;;  %1049 = vmatpush3.msra.mxu0 %v585_v44 }
 0x334   :  { %1060 = vmatprep.subr.mxu0 %v1103_v1 }
 0x3f2   :  { %v493_v41 = vpop.f32.mrf.mxu0 }
 0x3f3   :  { %v494_v42 = vadd.f32 %v944_v40, %v493_v41 }
 0x3f4   :  { %v1042_v43 = vpop.f32.mrf.mxu0 }
 0x3f5   :  { %498 = vst.msk [vmem:[%s1419_s21] sm:$0xff] %vm497_vm6, %v494_v42  ;;  %1046 = vmatmul.mubr.msk.f32.vlgmr.msra.gmra.mxu1 %vm497_vm6, %v494_v42 }
 0x3f6   :  { %1057 = vmatprep.mubr.msk.f32.mxu1 %vm1104_vm0, %v1103_v1  ;;  %1054 = vmatpush3.msra.mxu1 %v668_v50 }
 0x3f7   :  { %1055 = vmatprep.subr.mxu1 %v1103_v1 }
 0x3f8   :  { %1056 = vmatpush3.msra.mxu1 %v667_v51 }
 0x3f9   :  { %1067 = vmatprep.subr.mxu1 %v1103_v1 }
 0x4b5   :  { %v580_v46 = vpop.f32.mrf.mxu1 }
 0x4b6   :  { %v581_v47 = vadd.f32 %v946_v45, %v580_v46 }
 0x4b7   :  { %v1047_v48 = vpop.f32.mrf.mxu1 }
 0x4b8   :  { %v584_v49 = vmax.f32 %v581_v47, 0.0 }
 0x4ba   :  { %1051 = vmatmul.mubr.msk.f32.vlgmr.msra.gmra.mxu0 %vm423_vm5, %v584_v49 }
 0x4bb   :  { %1064 = vmatprep.mubr.msk.f32.mxu0 %vm1104_vm0, %v1103_v1  ;;  %1061 = vmatpush3.msra.mxu0 %v751_v57 }
 0x4bc   :  { %1062 = vmatprep.subr.mxu0 %v1103_v1 }
 0x4bd   :  { %1063 = vmatpush3.msra.mxu0 %v750_v58 }
 0x57a   :  { %v662_v53 = vpop.f32.mrf.mxu0 }
 0x57b   :  { %v663_v54 = vadd.f32 %v949_v52, %v662_v53 }
 0x57c   :  { %v1052_v55 = vpop.f32.mrf.mxu0 }
 0x57d   :  { %v666_v56 = vmax.f32 %v663_v54, 0.0 }
 0x57f   :  { %1058 = vmatmul.mubr.msk.f32.vlgmr.msra.gmra.mxu1 %vm257_vm3, %v666_v56 }
 0x580   :  { %1075 = vmatprep.mubr.msk.f32.mxu1 %vm1104_vm0, %v1103_v1  ;;  %1068 = vmatpush3.msra.mxu1 %v836_v59 }
 0x581   :  { %1069 = vmatprep.subr.mxu1 %v1103_v1 }
 0x582   :  { %1070 = vmatpush3.msra.mxu1 %v835_v2 }
 0x583   :  { %1071 = vmatprep.subr.mxu1 %v1103_v1 }
 0x584   :  { %1072 = vmatpush3.msra.mxu1 %v834_v3 }
 0x585   :  { %1073 = vmatprep.subr.mxu1 %v1103_v1 }
 0x586   :  { %1074 = vmatpush3.msra.mxu1 %v833_v4 }
 0x63f   :  { %v745_v61 = vpop.f32.mrf.mxu1 }
 0x640   :  { %v746_v62 = vadd.f32 %v951_v60, %v745_v61 }
 0x641   :  { %v1059_v63 = vpop.f32.mrf.mxu1 }
 0x642   :  { %v749_v0 = vmax.f32 %v746_v62, 0.0 }
 0x644   :  { %1065 = vmatmul.mubr.msk.f32.vlgmr.msra.gmra.mxu0 %vm257_vm3, %v749_v0 }
 0x704   :  { %v828_v6 = vpop.f32.mrf.mxu0 }
 0x705   :  { %v829_v7 = vadd.f32 %v953_v5, %v828_v6 }
 0x706   :  { %v1066_v8 = vpop.f32.mrf.mxu0 }
 0x707   :  { %v832_v9 = vmax.f32 %v829_v7, 0.0 }
 0x709   :  { %1076 = vmatmul.mubr.msk.f32.vlgmr.msra.gmra.mxu1 %vm173_vm2, %v832_v9 }
 0x7c9   :  { %v913_v1 = vpop.f32.mrf.mxu1 }
 0x7ca   :  { %v914_v11 = vadd.f32 %v955_v10, %v913_v1 }
 0x7cb   :  { %v1077_v12 = vpop.f32.mrf.mxu1 }
 0x7cc   :  { %917 = vst.msk [vmem:[#allocation2] sm:$0xff] %vm87_vm1, %v914_v11 }
 0x7cd   :  { %1092 = shalt.err (!%p1089_p4)
}
 0x7ce   :  { %929 = dma.vmem_to_hbm [thread:$0]  %s927_s15, 128, %s1420_s22, [#allocation3]  }
 0x7cf   :  { %1101 = dma.done.wait [#allocation3], 128  }
 0x7d0   :  { %1102 = vsyncadd [#allocation3], 4294967168 }
 0x7d1   :  { %935 = vsyncpa [#allocation3], 1 }

</bundles_post_ra>
